<compile_context>
chip_gen: v7x
topology: tpu7x:2x2x1
jax: 0.10.0
libtpu: 0.0.40
codegen_flags: <defaults>
</compile_context>

<pallas_src>
import jax
import jax.numpy as jnp
from jax.experimental import pallas as pl
from jax.experimental.pallas import tpu as pltpu


# ---------------------------------------------------------------------------
# Pallas kernel: population fitness (phenome = 1 / tour length)
# ---------------------------------------------------------------------------
def _phenome_kernel(g_ref, dist_t_ref, out_ref):
    # g_ref:      (1, C*P_TILE) int32  tours for this tile, flattened
    #                                  position-major (lane r = n*P_TILE + p)
    # dist_t_ref: (C, C)        f32    distance metric, pre-transposed in wrapper
    # out_ref:    (1, P_TILE)   f32    phenomes, lane-dense (P_TILE % 128 == 0)
    C = dist_t_ref.shape[0]
    P = out_ref.shape[1]                                # P_TILE
    CP = g_ref.shape[1]                                 # C * P_TILE

    g = g_ref[...]                                      # city at (pos n, chrom p)
    # Next city in the tour: rolling the flattened row by P lanes maps position
    # n -> n+1 for every chromosome in this tile (pos C-1 wraps to 0 correctly;
    # flattening is tile-local so no cross-tile mixing).
    gn = pltpu.roll(g, shift=CP - P, axis=1)            # (1, CP)

    city = jax.lax.broadcasted_iota(jnp.int32, (C, CP), 0)
    # NOTE: one-hots kept in f32 so the rtol=1e-5 check vs the f32 reference
    # holds; cast oh_cur/oh_nxt (and dist + reference) to bf16 for ~2x MXU
    # throughput on v6e/v7x once the problem is compute-bound.
    oh_cur = (g == city).astype(jnp.float32)            # (C, CP) one-hot of g
    oh_nxt = (gn == city).astype(jnp.float32)           # (C, CP) one-hot of gn

    # rows[j, r] = dist[g_r, j]   -- single MXU matmul (M=C, K=C, N=C*P_TILE)
    rows = jnp.dot(dist_t_ref[...], oh_cur, preferred_element_type=jnp.float32)
    # Keep only dist[g_r, gn_r] per tour step, then collapse the city axis.
    w = rows * oh_nxt                                   # (C, CP)
    d = jnp.sum(w, axis=0, keepdims=True)               # (1, CP) per-edge distance

    # log2(C) roll-and-add segment sum over positions (replaces the old
    # (C*P, P) selector matmul): every lane r accumulates its chromosome's
    # full tour length because lane r + j*P is position n+j of the same
    # chromosome and CP is an exact multiple of P.
    total = jnp.zeros_like(d)
    cur = d            # cur[r] = sum of `win` consecutive positions starting at r
    win = 1
    off = 0            # total[r] = sum of positions [n, n+off)
    rem = C
    while rem > 0:
        if rem & 1:
            shifted = cur if off == 0 else pltpu.roll(cur, shift=CP - off * P, axis=1)
            total = total + shifted
            off += win
        rem >>= 1
        if rem:
            cur = cur + pltpu.roll(cur, shift=CP - win * P, axis=1)
            win *= 2

    lengths = total[:, :P]                               # (1, P_TILE), lane-dense
    out_ref[...] = pl.reciprocal(lengths, approx=False)  # phenome = 1 / tour length


def population_phenomes(genes, dist, p_tile=128):
    """genes (P, C) int32, dist (C, C) f32 -> phenomes (P,) f32 via the Pallas kernel."""
    genes = genes.astype(jnp.int32)
    P, C = genes.shape
    # Pad P up to a multiple of the lane-dense tile (padded rows are copies of
    # row 0: valid tours, positive length, sliced off afterwards).
    p_pad = ((P + p_tile - 1) // p_tile) * p_tile
    if p_pad != P:
        genes_pad = jnp.concatenate(
            [genes, jnp.broadcast_to(genes[:1], (p_pad - P, C))], axis=0)
    else:
        genes_pad = genes
    num_tiles = p_pad // p_tile

    # Tile-local, position-major flattening in the wrapper (cheap XLA ops):
    # lane r within tile t = n*p_tile + p_local.
    g_flat = (genes_pad.reshape(num_tiles, p_tile, C)
              .transpose(0, 2, 1)
              .reshape(1, num_tiles * C * p_tile))
    dist_t = dist.astype(jnp.float32).T          # kernel left-multiplies => dist[g, j]

    out = pl.pallas_call(
        _phenome_kernel,
        out_shape=jax.ShapeDtypeStruct((1, p_pad), jnp.float32),
        grid=(num_tiles,),
        in_specs=[
            pl.BlockSpec((1, C * p_tile), lambda i: (0, i)),   # gene tile
            pl.BlockSpec((C, C), lambda i: (0, 0)),            # dist stays resident
        ],
        out_specs=pl.BlockSpec((1, p_tile), lambda i: (0, i)),  # lane-dense output
        compiler_params=pltpu.CompilerParams(
            # P tiles are independent chromosomes -> shard across v7x's 2 TCs.
            dimension_semantics=("parallel",)),
    )(g_flat, dist_t)
    return out[0, :P]


def tour_lengths_ref(genes, dist):
    """Pure-JAX reference for correctness checking."""
    nxt = jnp.roll(genes, -1, axis=1)
    return jnp.sum(dist[genes, nxt], axis=1)


# ---------------------------------------------------------------------------
# GA glue (selection / crossover / mutation / replacement) -- fully on-device
# ---------------------------------------------------------------------------
class Params:
    population_size = 16
    tournament_size = 4
    p_mutate = 0.5
    p_crossover = 0.9
    max_generations = 8


NUM_CITY = 16


def generate_distance_metric(key, num_city):
    # TODO(synk): original module loads the metric from config.path (file I/O);
    # build a deterministic Euclidean metric in-script instead.
    coords = jax.random.uniform(key, (num_city, 2), dtype=jnp.float32)
    diff = coords[:, None, :] - coords[None, :, :]
    return jnp.sqrt(jnp.sum(diff * diff, axis=-1))


def _children_phenomes(genes2, dist):
    # Both children per generation evaluated with one fused, batched O(C)
    # gather+sum (exact, branch-free) -- no per-generation Pallas launch.
    nxt = jnp.roll(genes2, -1, axis=1)
    lengths = jnp.sum(dist[genes2, nxt], axis=1)
    return 1.0 / lengths


def _tournament(key, phenomes, tournament_size):
    idx = jax.random.choice(key, phenomes.shape[0], shape=(tournament_size,),
                            replace=False)
    return idx[jnp.argmax(phenomes[idx])]


def _mutate(key, gene, p_mutate):
    # Swap mutation (keeps the gene a valid permutation), applied w.p. p_mutate.
    k_pos, k_p = jax.random.split(key)
    num_city = gene.shape[0]
    ij = jax.random.randint(k_pos, (2,), 0, num_city)
    i, j = ij[0], ij[1]
    gi, gj = gene[i], gene[j]
    swapped = gene.at[i].set(gj).at[j].set(gi)
    return jnp.where(jax.random.uniform(k_p) < p_mutate, swapped, gene)


def _replace_weakest(population, phenomes, child_gene, child_phenome):
    weakest = jnp.argmin(phenomes)
    better = child_phenome > phenomes[weakest]
    population = population.at[weakest].set(
        jnp.where(better, child_gene, population[weakest]))
    phenomes = phenomes.at[weakest].set(
        jnp.where(better, child_phenome, phenomes[weakest]))
    return population, phenomes


def make_forward(num_city, params):
    pop_size = params.population_size
    tsize = params.tournament_size
    p_mut = params.p_mutate
    max_gen = params.max_generations

    @jax.jit
    def forward(key, dist):
        """forward(): evolve the population, track the best chromosome on-device.
        One compiled program: no per-generation host syncs or kernel launches."""
        k_pop, k_loop = jax.random.split(key)
        # pop_size independent random tours (argsort of uniforms = random perms).
        population = jnp.argsort(
            jax.random.uniform(k_pop, (pop_size, num_city)), axis=1).astype(jnp.int32)
        phenomes = population_phenomes(population, dist)     # Pallas fitness kernel

        bidx = jnp.argmax(phenomes)
        best_gene = population[bidx]
        best_phenome = phenomes[bidx]

        # TODO(synk): the remaining wall-clock is max_generations x tiny-HLO glue;
        # a further win is fusing this whole loop into one Pallas kernel
        # (population in VMEM scratch, pltpu.prng_* for mutation, pl.loop).
        def generation(_, carry):
            key, population, phenomes, best_gene, best_phenome = carry
            key, k_s1, k_s2, k_m1, k_m2 = jax.random.split(key, 5)
            p1 = _tournament(k_s1, phenomes, tsize)
            p2 = _tournament(k_s2, phenomes, tsize)
            # TODO(synk): ordered/partialmap/scramble crossover need data-dependent
            # permutation repair with no clean vectorized form; this script runs the
            # module's 'no_crossover' configuration.
            g1, g2 = population[p1], population[p2]
            g1 = _mutate(k_m1, g1, p_mut)
            g2 = _mutate(k_m2, g2, p_mut)
            phe = _children_phenomes(jnp.stack([g1, g2]), dist)
            population, phenomes = _replace_weakest(population, phenomes, g1, phe[0])
            population, phenomes = _replace_weakest(population, phenomes, g2, phe[1])
            # Track the running best entirely on device.
            nidx = jnp.argmax(phenomes)
            improved = phenomes[nidx] > best_phenome
            best_phenome = jnp.where(improved, phenomes[nidx], best_phenome)
            best_gene = jnp.where(improved, population[nidx], best_gene)
            return key, population, phenomes, best_gene, best_phenome

        carry = (k_loop, population, phenomes, best_gene, best_phenome)
        carry = jax.lax.fori_loop(0, max_gen, generation, carry)
        _, population, phenomes, best_gene, best_phenome = carry
        return population, phenomes, best_gene, best_phenome

    return forward


if __name__ == "__main__":
    key = jax.random.PRNGKey(0)
    k_dist, k_ga = jax.random.split(key)

    dist = generate_distance_metric(k_dist, NUM_CITY)
    forward = make_forward(NUM_CITY, Params)

    population, phenomes, best_gene, best_phenome = forward(k_ga, dist)
    population = jax.block_until_ready(population)
    phenomes = jax.block_until_ready(phenomes)
    best_gene = jax.block_until_ready(best_gene)
    best_phenome = float(jax.block_until_ready(best_phenome))

    # Correctness: Pallas fitness kernel vs pure-JAX reference on the final population.
    phe_kernel = jax.block_until_ready(population_phenomes(population, dist))
    phe_ref = 1.0 / tour_lengths_ref(population, dist)
    assert population.shape == (Params.population_size, NUM_CITY)
    assert phe_kernel.shape == (Params.population_size,)
    assert jnp.allclose(phe_kernel, phe_ref, rtol=1e-5, atol=1e-6)
    # Phenomes carried through the on-device evolve loop must agree with the kernel.
    assert jnp.allclose(phenomes, phe_ref, rtol=1e-5, atol=1e-6)
    # Every chromosome must remain a valid permutation of the cities.
    assert bool(jnp.all(jnp.sort(population, axis=1)
                        == jnp.arange(NUM_CITY, dtype=population.dtype)[None, :]))
    assert best_gene.shape == (NUM_CITY,)
    assert best_phenome > 0.0
    assert best_phenome >= float(phe_ref.max()) - 1e-6

    print("KERNEL_OK")
</pallas_src>

<mosaic_0001>
module attributes {stable_mosaic.version = 11 : i64} {
  func.func @_phenome_kernel(%arg0: i32, %arg1: memref<1x2048xi32, #tpu.memory_space<vmem>>, %arg2: memref<16x16xf32, #tpu.memory_space<vmem>>, %arg3: memref<1x128xf32, #tpu.memory_space<vmem>>) attributes {dimension_semantics = [#tpu.dimension_semantics<parallel>], iteration_bounds = array<i64: 1>, scalar_prefetch = 0 : i64, scratch_operands = 0 : i64, tpu.core_type = #tpu.core_type<tc>, window_params = [{transform_indices = @transform_0, window_bounds = array<i64: 1, 2048>}, {pipeline_mode = #tpu.pipeline_mode<synchronous>, transform_indices = @transform_1, window_bounds = array<i64: 16, 16>}, {transform_indices = @transform_2, window_bounds = array<i64: 1, 128>}]} {
    %c0 = arith.constant 0 : index
    %c0_0 = arith.constant 0 : index
    %0 = vector.load %arg1[%c0, %c0_0] : memref<1x2048xi32, #tpu.memory_space<vmem>>, vector<1x2048xi32>
    %c1920_i32 = arith.constant 1920 : i32
    %1 = tpu.dynamic_rotate %0 by %c1920_i32 dim 1 : vector<1x2048xi32>, i32 -> vector<1x2048xi32>
    %2 = tpu.iota {dimensions = array<i32: 0>} : vector<16x2048xi32>
    %3 = vector.broadcast %0 : vector<1x2048xi32> to vector<16x2048xi32>
    %4 = arith.cmpi eq, %3, %2 : vector<16x2048xi32>
    %5 = arith.extui %4 : vector<16x2048xi1> to vector<16x2048xi32>
    %6 = arith.sitofp %5 : vector<16x2048xi32> to vector<16x2048xf32>
    %7 = vector.broadcast %1 : vector<1x2048xi32> to vector<16x2048xi32>
    %8 = arith.cmpi eq, %7, %2 : vector<16x2048xi32>
    %9 = arith.extui %8 : vector<16x2048xi1> to vector<16x2048xi32>
    %10 = arith.sitofp %9 : vector<16x2048xi32> to vector<16x2048xf32>
    %c0_1 = arith.constant 0 : index
    %c0_2 = arith.constant 0 : index
    %11 = vector.load %arg2[%c0_1, %c0_2] : memref<16x16xf32, #tpu.memory_space<vmem>>, vector<16x16xf32>
    %cst = arith.constant dense<0.000000e+00> : vector<16x2048xf32>
    %12 = tpu.matmul %11, %6, %cst {dimension_numbers = #tpu.dot_dimension_numbers<[1], [0], [0], [1], [0, 0, 1, 1], [], []>} : vector<16x16xf32>, vector<16x2048xf32>, vector<16x2048xf32> -> vector<16x2048xf32>
    %13 = arith.mulf %12, %10 : vector<16x2048xf32>
    %cst_3 = arith.constant dense<0.000000e+00> : vector<2048xf32>
    %14 = vector.multi_reduction <add>, %13, %cst_3 [0] : vector<16x2048xf32> to vector<2048xf32>
    %15 = vector.shape_cast %14 : vector<2048xf32> to vector<1x2048xf32>
    %cst_4 = arith.constant 0.000000e+00 : f32
    %16 = vector.broadcast %cst_4 : f32 to vector<1x2048xf32>
    %c1920_i32_5 = arith.constant 1920 : i32
    %17 = tpu.dynamic_rotate %15 by %c1920_i32_5 dim 1 : vector<1x2048xf32>, i32 -> vector<1x2048xf32>
    %18 = arith.addf %15, %17 : vector<1x2048xf32>
    %c1792_i32 = arith.constant 1792 : i32
    %19 = tpu.dynamic_rotate %18 by %c1792_i32 dim 1 : vector<1x2048xf32>, i32 -> vector<1x2048xf32>
    %20 = arith.addf %18, %19 : vector<1x2048xf32>
    %c1536_i32 = arith.constant 1536 : i32
    %21 = tpu.dynamic_rotate %20 by %c1536_i32 dim 1 : vector<1x2048xf32>, i32 -> vector<1x2048xf32>
    %22 = arith.addf %20, %21 : vector<1x2048xf32>
    %c1024_i32 = arith.constant 1024 : i32
    %23 = tpu.dynamic_rotate %22 by %c1024_i32 dim 1 : vector<1x2048xf32>, i32 -> vector<1x2048xf32>
    %24 = arith.addf %22, %23 : vector<1x2048xf32>
    %25 = arith.addf %16, %24 : vector<1x2048xf32>
    %26 = vector.extract_strided_slice %25 {offsets = [0, 0], sizes = [1, 128], strides = [1, 1]} : vector<1x2048xf32> to vector<1x128xf32>
    %27 = tpu.reciprocal %26 : vector<1x128xf32> -> vector<1x128xf32>
    %c0_6 = arith.constant 0 : index
    %c0_7 = arith.constant 0 : index
    %28 = vector.load %arg3[%c0_6, %c0_7] : memref<1x128xf32, #tpu.memory_space<vmem>>, vector<1x128xf32>
    tpu.vector_store %arg3[%c0_6, %c0_7], %27 {strides = array<i32>} : memref<1x128xf32, #tpu.memory_space<vmem>>, vector<1x128xf32>,
    return
  }
  func.func @transform_0(%arg0: i32) -> (i32, i32) {
    %c0_i32 = arith.constant 0 : i32
    %c0_i32_0 = arith.constant 0 : i32
    return %c0_i32, %arg0 : i32, i32
  }
  func.func @transform_1(%arg0: i32) -> (i32, i32) {
    %c0_i32 = arith.constant 0 : i32
    %c0_i32_0 = arith.constant 0 : i32
    %c0_i32_1 = arith.constant 0 : i32
    return %c0_i32, %c0_i32_0 : i32, i32
  }
  func.func @transform_2(%arg0: i32) -> (i32, i32) {
    %c0_i32 = arith.constant 0 : i32
    %c0_i32_0 = arith.constant 0 : i32
    return %c0_i32, %arg0 : i32, i32
  }
}

</mosaic_0001>

<bundles_post_ra>
// kernel: forward.1
= control target key start
LH: loop header
LB: loop body
LE: loop exit
PB: predicated region body
PF: predicated region fallthrough
CT: control target
= control target key end

     0   :  { %v13_v0 = vlaneseq  ;;  %v1275_v1 = vmov 0.0   ;;  %v1276_v21 = vmov 1.0|1.0   ;;  %s1733_s0 = inlined_call_operand.vmem [shape: s32[1,2048], index: 0, kind: input, shape index: {}]   ;;  %s1734_s1 = inlined_call_operand.vmem [shape: f32[16,16], index: 1, kind: input, shape index: {}]   ;;  %s1735_s2 = inlined_call_operand.vmem [shape: f32[1,128], index: 2, kind: output, shape index: {}]  }
   0x1   :  { %409 = vmatprep.mubr.f32.mxu0 %v1275_v1  ;;  %486 = vmatprep.mubr.f32.mxu1 %v1275_v1  ;;  %v11_v3 = vld [vmem:[%s1733_s0] sm:$0xff]  ;;  %v1332_v20 = vld [vmem:[%s1733_s0 + $0x8] sm:$0xff] }
   0x2   :  { %v1294_v2 = vshrl.u32 %v13_v0, 7  ;;  %v1374_v24 = vld [vmem:[%s1734_s1] sm:$0xff]  ;;  %v337_v28 = vld [vmem:[%s1734_s1 + $0x8] sm:$0xff] }
   0x4   :  { %v19_v4 = vsub.s32 1, %v1294_v2  ;;  %v1301_v5 = vadd.s32 8, %v1294_v2  ;;  %v27_v6 = vsub.s32 3, %v1294_v2  ;;  %v1305_v7 = vsub.s32 0, %v1294_v2 }
   0x5   :  { %v23_v8 = vsub.s32 2, %v1294_v2  ;;  %v35_v9 = vsub.s32 5, %v1294_v2  ;;  %v43_v10 = vsub.s32 7, %v1294_v2  ;;  %v31_v11 = vsub.s32 4, %v1294_v2 }
   0x6   :  { %v1311_v12 = vrot.slane %v11_v3, %v19_v4  ;;  %v1313_v13 = vrot.slane %v11_v3, %v27_v6  ;;  %v1316_v14 = vrot.slane %v11_v3, %v1305_v7  ;;  %v39_v15 = vsub.s32 6, %v1294_v2 }
   0x7   :  { %v1319_v16 = vrot.slane %v11_v3, %v23_v8  ;;  %v1321_v17 = vrot.slane %v11_v3, %v35_v9  ;;  %v1323_v18 = vrot.slane %v11_v3, %v43_v10  ;;  %v1327_v19 = vrot.slane %v11_v3, %v31_v11 }
   0x8   :  { %vm81_vm0 = vcmp.eq.s32.totalorder %v1311_v12, %v1294_v2  ;;  %vm97_vm1 = vcmp.eq.s32.totalorder %v1311_v12, %v1301_v5  ;;  %vm83_vm2 = vcmp.eq.s32.totalorder %v1313_v13, %v1294_v2  ;;  %vm99_vm3 = vcmp.eq.s32.totalorder %v1313_v13, %v1301_v5 }
   0x9   :  { %vm1239_vm4 = vmpackc.low %vm97_vm1, %vm81_vm0  ;;  %vm80_vm5 = vcmp.eq.s32.totalorder %v1316_v14, %v1294_v2  ;;  %vm96_vm6 = vcmp.eq.s32.totalorder %v1316_v14, %v1301_v5  ;;  %vm82_vm7 = vcmp.eq.s32.totalorder %v1319_v16, %v1294_v2  ;;  %vm98_vm8 = vcmp.eq.s32.totalorder %v1319_v16, %v1301_v5 }
   0xa   :  { %1240 = vmatprep.subr.msk.bf16.mxu0 %vm1239_vm4, %v1276_v21  ;;  %vm1243_vm9 = vmpackc.low %vm99_vm3, %vm83_vm2  ;;  %vm85_vm10 = vcmp.eq.s32.totalorder %v1321_v17, %v1294_v2  ;;  %vm101_vm11 = vcmp.eq.s32.totalorder %v1321_v17, %v1301_v5  ;;  %vm87_vm13 = vcmp.eq.s32.totalorder %v1323_v18, %v1294_v2  ;;  %vm103_vm14 = vcmp.eq.s32.totalorder %v1323_v18, %v1301_v5 }
   0xb   :  { %1244 = vmatprep.subr.msk.bf16.mxu1 %vm1243_vm9, %v1276_v21  ;;  %vm1241_vm12 = vmpackc.low %vm96_vm6, %vm80_vm5  ;;  %v1362_v22 = vrot.slane %v11_v3, %v39_v15  ;;  %v1365_v23 = vrot.slane %v1332_v20, %v19_v4  ;;  %vm338_vm0 = vcmask 130048   ;;  %vm84_vm1 = vcmp.eq.s32.totalorder %v1327_v19, %v1294_v2 }
   0xc   :  { %1242 = vmatpush1.bf16.msk.msra.mxu0 %vm1241_vm12, %v1276_v21  ;;  %vm1245_vm15 = vmpackc.low %vm98_vm8, %vm82_vm7  ;;  %vm100_vm2 = vcmp.eq.s32.totalorder %v1327_v19, %v1301_v5  ;;  %v1381_v25 = vrot.slane %v1332_v20, %v27_v6  ;;  %v1407_v26 = vrot.slane %v1332_v20, %v1305_v7  ;;  %v1417_v27 = vrot.slane %v1332_v20, %v23_v8 }
   0xd   :  { %1246 = vmatpush1.bf16.msk.msra.mxu1 %vm1245_vm15, %v1276_v21  ;;  %vm1247_vm3 = vmpackc.low %vm101_vm11, %vm85_vm10  ;;  %vm86_vm4 = vcmp.eq.s32.totalorder %v1362_v22, %v1294_v2  ;;  %vm102_vm5 = vcmp.eq.s32.totalorder %v1362_v22, %v1301_v5  ;;  %vm89_vm7 = vcmp.eq.s32.totalorder %v1365_v23, %v1294_v2  ;;  %vm105_vm8 = vcmp.eq.s32.totalorder %v1365_v23, %v1301_v5 }
   0xe   :  { %1248 = vmatprep.subr.msk.bf16.mxu0 %vm1247_vm3, %v1276_v21  ;;  %vm1251_vm6 = vmpackc.low %vm103_vm14, %vm87_vm13  ;;  %vm91_vm10 = vcmp.eq.s32.totalorder %v1381_v25, %v1294_v2  ;;  %vm107_vm11 = vcmp.eq.s32.totalorder %v1381_v25, %v1301_v5  ;;  %v1429_v29 = vrot.slane %v1332_v20, %v35_v9  ;;  %v1440_v30 = vrot.slane %v1332_v20, %v43_v10 }
   0xf   :  { %1195 = vmatmul.mubr.msk.f32.vlgmr.msra.gmra.mrb[0].mxu0 %vm338_vm0, %v1374_v24  ;;  %1252 = vmatprep.subr.msk.bf16.mxu1 %vm1251_vm6, %v1276_v21  ;;  %vm1249_vm9 = vmpackc.low %vm100_vm2, %vm84_vm1  ;;  %vm88_vm15 = vcmp.eq.s32.totalorder %v1407_v26, %v1294_v2  ;;  %vm104_vm1 = vcmp.eq.s32.totalorder %v1407_v26, %v1301_v5  ;;  %vm90_vm2 = vcmp.eq.s32.totalorder %v1417_v27, %v1294_v2 }
  0x10   :  { %1201 = vmatmul.mubr.msk.f32.vlgmr.msra.gmra.mrb[0].mxu1 %vm338_vm0, %v1374_v24  ;;  %1250 = vmatpush1.bf16.msk.msra.mxu0 %vm1249_vm9, %v1276_v21  ;;  %vm1253_vm12 = vmpackc.low %vm102_vm5, %vm86_vm4  ;;  %vm106_vm3 = vcmp.eq.s32.totalorder %v1417_v27, %v1301_v5  ;;  %vm93_vm4 = vcmp.eq.s32.totalorder %v1429_v29, %v1294_v2  ;;  %vm109_vm5 = vcmp.eq.s32.totalorder %v1429_v29, %v1301_v5 }
  0x11   :  { %1254 = vmatpush1.bf16.msk.msra.mxu1 %vm1253_vm12, %v1276_v21  ;;  %415 = vmatprep.mubr.f32.mxu0 %v1275_v1  ;;  %vm1255_vm13 = vmpackc.low %vm105_vm8, %vm89_vm7  ;;  %vm95_vm7 = vcmp.eq.s32.totalorder %v1440_v30, %v1294_v2  ;;  %vm111_vm8 = vcmp.eq.s32.totalorder %v1440_v30, %v1301_v5  ;;  %v1468_v31 = vrot.slane %v1332_v20, %v31_v11 }
  0x12   :  { %492 = vmatprep.mubr.f32.mxu1 %v1275_v1  ;;  %1256 = vmatprep.subr.msk.bf16.mxu0 %vm1255_vm13, %v1276_v21  ;;  %vm1259_vm14 = vmpackc.low %vm107_vm11, %vm91_vm10  ;;  %v1475_v32 = vrot.slane %v1332_v20, %v39_v15  ;;  %v179_v33 = vrot.slane %v1311_v12, %v1305_v7  ;;  %v187_v34 = vrot.slane %v1313_v13, %v1305_v7 }
  0x13   :  { %1196 = vmatmul.mubr.msk.f32.gmra.mrb[2].mxu0 %vm338_vm0, %v337_v28  ;;  %1260 = vmatprep.subr.msk.bf16.mxu1 %vm1259_vm14, %v1276_v21  ;;  %vm1257_vm6 = vmpackc.low %vm104_vm1, %vm88_vm15  ;;  %vm92_vm12 = vcmp.eq.s32.totalorder %v1468_v31, %v1294_v2  ;;  %vm108_vm13 = vcmp.eq.s32.totalorder %v1468_v31, %v1301_v5  ;;  %v183_v35 = vrot.slane %v1319_v16, %v1305_v7 }
  0x14   :  { %1202 = vmatmul.mubr.msk.f32.gmra.mrb[2].mxu1 %vm338_vm0, %v337_v28  ;;  %563 = vmatprep.mubr.f32.mxu0 %v1275_v1  ;;  %vm1261_vm9 = vmpackc.low %vm106_vm3, %vm90_vm2  ;;  %vm94_vm14 = vcmp.eq.s32.totalorder %v1475_v32, %v1294_v2  ;;  %vm110_vm15 = vcmp.eq.s32.totalorder %v1475_v32, %v1301_v5  ;;  %v191_v36 = vrot.slane %v1327_v19, %v1305_v7 }
  0x15   :  { %640 = vmatprep.mubr.f32.mxu1 %v1275_v1  ;;  %vm1263_vm10 = vmpackc.low %vm109_vm5, %vm93_vm4  ;;  %vm240_vm3 = vcmp.eq.s32.totalorder %v179_v33, %v1294_v2  ;;  %vm242_vm4 = vcmp.eq.s32.totalorder %v187_v34, %v1294_v2  ;;  %vm241_vm5 = vcmp.eq.s32.totalorder %v183_v35, %v1294_v2  ;;  %v195_v37 = vrot.slane %v1321_v17, %v1305_v7 }
  0x16   :  { %vm1267_vm11 = vmpackc.low %vm111_vm8, %vm95_vm7  ;;  %vm258_vm7 = vcmp.eq.s32.totalorder %v187_v34, %v1301_v5  ;;  %v203_v38 = vrot.slane %v1323_v18, %v1305_v7  ;;  %v199_v39 = vrot.slane %v1362_v22, %v1305_v7  ;;  %vm257_vm8 = vcmp.eq.s32.totalorder %v183_v35, %v1301_v5 }
  0x17   :  { %1207 = vmatmul.mubr.msk.f32.vlgmr.msra.gmra.mrb[4].mxu0 %vm338_vm0, %v1374_v24  ;;  %vm1265_vm1 = vmpackc.low %vm108_vm13, %vm92_vm12  ;;  %v207_v40 = vrot.slane %v1407_v26, %v1305_v7  ;;  %v1159_v41 = vsel %vm240_vm3, 1.0, %v1275_v1  ;;  %v1542_v42 = vsel %vm242_vm4, 1.0, %v1275_v1  ;;  %v1545_v43 = vsel %vm241_vm5, 1.0, %v1275_v1 }
  0x18   :  { %1213 = vmatmul.mubr.msk.f32.vlgmr.msra.gmra.mrb[4].mxu1 %vm338_vm0, %v1374_v24  ;;  %1258 = vmatpush1.bf16.msk.msra.mxu0 %vm1257_vm6, %v1276_v21  ;;  %vm1269_vm2 = vmpackc.low %vm110_vm15, %vm94_vm14  ;;  %vm256_vm6 = vcmp.eq.s32.totalorder %v179_v33, %v1301_v5  ;;  %v1552_v46 = vsel %vm258_vm7, 1.0, %v1275_v1  ;;  %v1176_v47 = vsel %vm257_vm8, 1.0, %v1275_v1  ;;  %vm245_vm12 = vcmp.eq.s32.totalorder %v199_v39, %v1294_v2 }
  0x19   :  { %1262 = vmatpush1.bf16.msk.msra.mxu1 %vm1261_vm9, %v1276_v21  ;;  %569 = vmatprep.mubr.f32.mxu0 %v1275_v1  ;;  %v1175_v45 = vsel %vm256_vm6, 1.0, %v1275_v1  ;;  %vm259_vm9 = vcmp.eq.s32.totalorder %v191_v36, %v1301_v5  ;;  %vm247_vm13 = vcmp.eq.s32.totalorder %v207_v40, %v1294_v2  ;;  %vm260_vm14 = vcmp.eq.s32.totalorder %v195_v37, %v1301_v5 }
  0x1a   :  { %646 = vmatprep.mubr.f32.mxu1 %v1275_v1  ;;  %1264 = vmatprep.subr.msk.bf16.mxu0 %vm1263_vm10, %v1276_v21  ;;  %vm244_vm10 = vcmp.eq.s32.totalorder %v195_v37, %v1294_v2  ;;  %vm262_vm15 = vcmp.eq.s32.totalorder %v203_v38, %v1301_v5  ;;  %v211_v48 = vrot.slane %v1365_v23, %v1305_v7  ;;  %v1178_v52 = vsel %vm259_vm9, 1.0, %v1275_v1 }
  0x1b   :  { %1208 = vmatmul.mubr.msk.f32.gmra.mrb[6].mxu0 %vm338_vm0, %v337_v28  ;;  %1268 = vmatprep.subr.msk.bf16.mxu1 %vm1267_vm11, %v1276_v21  ;;  %vm246_vm11 = vcmp.eq.s32.totalorder %v203_v38, %v1294_v2  ;;  %v219_v49 = vrot.slane %v1381_v25, %v1305_v7  ;;  %v215_v50 = vrot.slane %v1417_v27, %v1305_v7  ;;  %v1573_v53 = vsel %vm244_vm10, 1.0, %v1275_v1 }
  0x1c   :  { %1214 = vmatmul.mubr.msk.f32.gmra.mrb[6].mxu1 %vm338_vm0, %v337_v28  ;;  %717 = vmatprep.mubr.f32.mxu0 %v1275_v1  ;;  %v223_v51 = vrot.slane %v1468_v31, %v1305_v7  ;;  %v1576_v54 = vsel %vm246_vm11, 1.0, %v1275_v1  ;;  %v1579_v55 = vsel %vm245_vm12, 1.0, %v1275_v1  ;;  %v1582_v56 = vsel %vm247_vm13, 1.0, %v1275_v1 }
  0x1d   :  { %794 = vmatprep.mubr.f32.mxu1 %v1275_v1  ;;  %v1585_v57 = vsel %vm260_vm14, 1.0, %v1275_v1  ;;  %v227_v58 = vrot.slane %v1429_v29, %v1305_v7  ;;  %v1591_v59 = vrot.slane %v1440_v30, %v1305_v7  ;;  %v1594_v60 = vsel %vm262_vm15, 1.0, %v1275_v1 }
  0x1e   :  { %vm248_vm3 = vcmp.eq.s32.totalorder %v211_v48, %v1294_v2  ;;  %vm250_vm4 = vcmp.eq.s32.totalorder %v219_v49, %v1294_v2  ;;  %vm249_vm5 = vcmp.eq.s32.totalorder %v215_v50, %v1294_v2  ;;  %vm264_vm6 = vcmp.eq.s32.totalorder %v211_v48, %v1301_v5 }
  0x1f   :  { %1219 = vmatmul.mubr.msk.f32.vlgmr.msra.gmra.mrb[8].mxu0 %vm338_vm0, %v1374_v24  ;;  %vm266_vm7 = vcmp.eq.s32.totalorder %v219_v49, %v1301_v5  ;;  %vm265_vm8 = vcmp.eq.s32.totalorder %v215_v50, %v1301_v5  ;;  %vm267_vm9 = vcmp.eq.s32.totalorder %v223_v51, %v1301_v5  ;;  %v231_v63 = vrot.slane %v1475_v32, %v1305_v7 }
  0x20   :  { %1225 = vmatmul.mubr.msk.f32.vlgmr.msra.gmra.mrb[8].mxu1 %vm338_vm0, %v1374_v24  ;;  %1266 = vmatpush1.bf16.msk.msra.mxu0 %vm1265_vm1, %v1276_v21  ;;  %vm261_vm1 = vcmp.eq.s32.totalorder %v199_v39, %v1301_v5  ;;  %vm252_vm10 = vcmp.eq.s32.totalorder %v227_v58, %v1294_v2  ;;  %vm254_vm11 = vcmp.eq.s32.totalorder %v1591_v59, %v1294_v2  ;;  %v1623_v10 = vsel %vm248_vm3, 1.0, %v1275_v1 }
  0x21   :  { %1270 = vmatpush1.bf16.msk.msra.mxu1 %vm1269_vm2, %v1276_v21  ;;  %723 = vmatprep.mubr.f32.mxu0 %v1275_v1  ;;  %v1597_v61 = vsel %vm261_vm1, 1.0, %v1275_v1  ;;  %vm263_vm2 = vcmp.eq.s32.totalorder %v207_v40, %v1301_v5  ;;  %v239_v6 = vrot.slane %v1316_v14, %v1305_v7  ;;  %v1628_v11 = vsel %vm250_vm4, 1.0, %v1275_v1 }
  0x22   :  { %800 = vmatprep.mubr.f32.mxu1 %v1275_v1  ;;  %v1618_v9 = vsel %vm263_vm2, 1.0, %v1275_v1  ;;  %v1633_v7 = vsel %vm249_vm5, 1.0, %v1275_v1  ;;  %v1643_v13 = vsel %vm264_vm6, 1.0, %v1275_v1  ;;  %v1648_v14 = vsel %vm266_vm7, 1.0, %v1275_v1 }
  0x23   :  { %1220 = vmatmul.mubr.msk.f32.gmra.mrb[10].mxu0 %vm338_vm0, %v337_v28  ;;  %v1653_v15 = vsel %vm265_vm8, 1.0, %v1275_v1  ;;  %v1658_v17 = vsel %vm267_vm9, 1.0, %v1275_v1  ;;  %v1661_v18 = vsel %vm252_vm10, 1.0, %v1275_v1  ;;  %v1664_v19 = vsel %vm254_vm11, 1.0, %v1275_v1 }
  0x24   :  { %1226 = vmatmul.mubr.msk.f32.gmra.mrb[10].mxu1 %vm338_vm0, %v337_v28  ;;  %871 = vmatprep.mubr.f32.mxu0 %v1275_v1  ;;  %vm253_vm12 = vcmp.eq.s32.totalorder %v231_v63, %v1294_v2  ;;  %vm255_vm13 = vcmp.eq.s32.totalorder %v239_v6, %v1294_v2  ;;  %vm268_vm14 = vcmp.eq.s32.totalorder %v227_v58, %v1301_v5 }
  0x25   :  { %948 = vmatprep.mubr.f32.mxu1 %v1275_v1  ;;  %vm270_vm15 = vcmp.eq.s32.totalorder %v1591_v59, %v1301_v5  ;;  %vm269_vm1 = vcmp.eq.s32.totalorder %v231_v63, %v1301_v5  ;;  %v1679_v34 = vsel %vm253_vm12, 1.0, %v1275_v1  ;;  %vm271_vm2 = vcmp.eq.s32.totalorder %v239_v6, %v1301_v5 }
  0x26   :  { %v1685_v39 = vsel %vm255_vm13, 1.0, %v1275_v1  ;;  %v1690_v40 = vsel %vm268_vm14, 1.0, %v1275_v1  ;;  %v1705_v48 = vsel %vm271_vm2, 1.0, %v1275_v1 }
  0x27   :  { %1231 = vmatmul.mubr.msk.f32.vlgmr.msra.gmra.mrb[12].mxu0 %vm338_vm0, %v1374_v24 }
  0x28   :  { %1237 = vmatmul.mubr.msk.f32.vlgmr.msra.gmra.mrb[12].mxu1 %vm338_vm0, %v1374_v24  ;;  %877 = vmatprep.mubr.f32.mxu0 %v1275_v1 }
  0x29   :  { %954 = vmatprep.mubr.f32.mxu1 %v1275_v1 }
  0x2b   :  { %1232 = vmatmul.mubr.msk.f32.gmra.mrb[14].mxu0 %vm338_vm0, %v337_v28 }
  0x2c   :  { %1238 = vmatmul.mubr.msk.f32.gmra.mrb[14].mxu1 %vm338_vm0, %v337_v28  ;;  %vm243_vm0 = vcmp.eq.s32.totalorder %v191_v36, %v1294_v2 }
  0x2d   :  { %v1548_v44 = vsel %vm243_vm0, 1.0, %v1275_v1  ;;  %vm251_vm0 = vcmp.eq.s32.totalorder %v223_v51, %v1294_v2  ;;  %v1701_v2 = vsel %vm269_vm1, 1.0, %v1275_v1 }
  0x2e   :  { %v1638_v12 = vsel %vm251_vm0, 1.0, %v1275_v1 }
  0xe2   :  { %v411_v62 = vpop.f32.mrb[0].mxu0 }
  0xe3   :  { %v961_v0 = vmul.f32 %v1159_v41, %v411_v62  ;;  %v488_v3 = vpop.f32.mrb[0].mxu1  ;;  %v413_v4 = vpop.f32.mrb[1].mxu0 }
  0xe4   :  { %v490_v8 = vpop.f32.mrb[1].mxu1  ;;  %v963_v23 = vmul.f32 %v1542_v42, %v488_v3  ;;  %v962_v24 = vmul.f32 %v1545_v43, %v413_v4 }
  0xe5   :  { %v964_v28 = vmul.f32 %v1548_v44, %v490_v8  ;;  %v1696_v44 = vsel %vm270_vm15, 1.0, %v1275_v1 }
  0xe6   :  { %v417_v16 = vpop.f32.mrb[2].mxu0 }
  0xe7   :  { %v977_v20 = vmul.f32 %v1175_v45, %v417_v16  ;;  %v494_v21 = vpop.f32.mrb[2].mxu1  ;;  %v419_v22 = vpop.f32.mrb[3].mxu0 }
  0xe8   :  { %v979_v25 = vmul.f32 %v1552_v46, %v494_v21  ;;  %v978_v26 = vmul.f32 %v1176_v47, %v419_v22  ;;  %v496_v27 = vpop.f32.mrb[3].mxu1 }
  0xe9   :  { %v993_v29 = vadd.f32 %v977_v20, %v961_v0  ;;  %v980_v30 = vmul.f32 %v1178_v52, %v496_v27 }
  0xea   :  { %v1007_v31 = vadd.f32 %v979_v25, %v963_v23  ;;  %v1000_v32 = vadd.f32 %v978_v26, %v962_v24  ;;  %v565_v33 = vpop.f32.mrb[4].mxu0 }
  0xeb   :  { %v994_v35 = vrot.slane %v993_v29, 4  ;;  %v1014_v36 = vadd.f32 %v980_v30, %v964_v28  ;;  %v642_v37 = vpop.f32.mrb[4].mxu1  ;;  %v567_v38 = vpop.f32.mrb[5].mxu0  ;;  %v965_v47 = vmul.f32 %v1573_v53, %v565_v33 }
  0xec   :  { %v1008_v41 = vrot.slane %v1007_v31, 4  ;;  %v1001_v42 = vrot.slane %v1000_v32, 4  ;;  %v644_v43 = vpop.f32.mrb[5].mxu1  ;;  %v967_v51 = vmul.f32 %v1576_v54, %v642_v37  ;;  %v966_v52 = vmul.f32 %v1579_v55, %v567_v38 }
  0xed   :  { %v995_v45 = vadd.f32 %v994_v35, %v993_v29  ;;  %v1015_v46 = vrot.slane %v1014_v36, 4  ;;  %v968_v5 = vmul.f32 %v1582_v56, %v644_v43 }
  0xee   :  { %v1009_v49 = vadd.f32 %v1008_v41, %v1007_v31  ;;  %v1002_v50 = vadd.f32 %v1001_v42, %v1000_v32  ;;  %v571_v58 = vpop.f32.mrb[6].mxu0 }
  0xef   :  { %v996_v59 = vrot.slane %v995_v45, 2  ;;  %v1016_v62 = vadd.f32 %v1015_v46, %v1014_v36  ;;  %v981_v63 = vmul.f32 %v1585_v57, %v571_v58  ;;  %v648_v0 = vpop.f32.mrb[6].mxu1  ;;  %v573_v3 = vpop.f32.mrb[7].mxu0 }
  0xf0   :  { %v1010_v4 = vrot.slane %v1009_v49, 2  ;;  %v1003_v53 = vrot.slane %v1002_v50, 2  ;;  %v983_v1 = vmul.f32 %v1594_v60, %v648_v0  ;;  %v982_v6 = vmul.f32 %v1597_v61, %v573_v3  ;;  %v650_v8 = vpop.f32.mrb[7].mxu1 }
  0xf1   :  { %v997_v16 = vadd.f32 %v996_v59, %v995_v45  ;;  %v1017_v54 = vrot.slane %v1016_v62, 2  ;;  %v1021_v20 = vadd.f32 %v981_v63, %v965_v47  ;;  %v984_v55 = vmul.f32 %v1618_v9, %v650_v8 }
  0xf2   :  { %v1011_v21 = vadd.f32 %v1010_v4, %v1009_v49  ;;  %v1004_v22 = vadd.f32 %v1003_v53, %v1002_v50  ;;  %v1035_v23 = vadd.f32 %v983_v1, %v967_v51  ;;  %v1028_v56 = vadd.f32 %v982_v6, %v966_v52  ;;  %v719_v24 = vpop.f32.mrb[8].mxu0 }
  0xf3   :  { %v998_v57 = vrot.slane %v997_v16, 1  ;;  %v1018_v25 = vadd.f32 %v1017_v54, %v1016_v62  ;;  %v1022_v26 = vrot.slane %v1021_v20, 4  ;;  %v1042_v27 = vadd.f32 %v984_v55, %v968_v5  ;;  %v796_v28 = vpop.f32.mrb[8].mxu1  ;;  %v721_v29 = vpop.f32.mrb[9].mxu0 }
  0xf4   :  { %v1012_v60 = vrot.slane %v1011_v21, 1  ;;  %v1005_v30 = vrot.slane %v1004_v22, 1  ;;  %v1036_v61 = vrot.slane %v1035_v23, 4  ;;  %v1029_v31 = vrot.slane %v1028_v56, 4  ;;  %v798_v32 = vpop.f32.mrb[9].mxu1 }
  0xf5   :  { %v999_v33 = vadd.f32 %v998_v57, %v997_v16  ;;  %v1019_v35 = vrot.slane %v1018_v25, 1  ;;  %v1023_v36 = vadd.f32 %v1022_v26, %v1021_v20  ;;  %v1043_v9 = vrot.slane %v1042_v27, 4 }
  0xf6   :  { %v1013_v37 = vadd.f32 %v1012_v60, %v1011_v21  ;;  %v1006_v38 = vadd.f32 %v1005_v30, %v1004_v22  ;;  %v1037_v41 = vadd.f32 %v1036_v61, %v1035_v23  ;;  %v1030_v42 = vadd.f32 %v1029_v31, %v1028_v56  ;;  %v725_v43 = vpop.f32.mrb[10].mxu0 }
  0xf7   :  { %v1020_v45 = vadd.f32 %v1019_v35, %v1018_v25  ;;  %v1024_v46 = vrot.slane %v1023_v36, 2  ;;  %v1044_v47 = vadd.f32 %v1043_v9, %v1042_v27  ;;  %v969_v49 = vmul.f32 %v1623_v10, %v719_v24  ;;  %v802_v50 = vpop.f32.mrb[10].mxu1  ;;  %v727_v51 = vpop.f32.mrb[11].mxu0 }
  0xf8   :  { %v1105_v52 = vadd.f32 %v1006_v38, %v999_v33  ;;  %v1038_v58 = vrot.slane %v1037_v41, 2  ;;  %v1031_v59 = vrot.slane %v1030_v42, 2  ;;  %v971_v62 = vmul.f32 %v1628_v11, %v796_v28  ;;  %v804_v5 = vpop.f32.mrb[11].mxu1 }
  0xf9   :  { %v1106_v63 = vadd.f32 %v1020_v45, %v1013_v37  ;;  %v1025_v0 = vadd.f32 %v1024_v46, %v1023_v36  ;;  %v1045_v3 = vrot.slane %v1044_v47, 2  ;;  %v970_v4 = vmul.f32 %v1633_v7, %v721_v29 }
  0xfa   :  { %v1039_v53 = vadd.f32 %v1038_v58, %v1037_v41  ;;  %v1032_v1 = vadd.f32 %v1031_v59, %v1030_v42  ;;  %v972_v6 = vmul.f32 %v1638_v12, %v798_v32  ;;  %v985_v8 = vmul.f32 %v1643_v13, %v725_v43  ;;  %v873_v10 = vpop.f32.mrb[12].mxu0 }
  0xfb   :  { %v1113_v16 = vadd.f32 %v1106_v63, %v1105_v52  ;;  %v1026_v54 = vrot.slane %v1025_v0, 1  ;;  %v1046_v20 = vadd.f32 %v1045_v3, %v1044_v47  ;;  %v987_v55 = vmul.f32 %v1648_v14, %v802_v50  ;;  %v950_v21 = vpop.f32.mrb[12].mxu1  ;;  %v875_v11 = vpop.f32.mrb[13].mxu0 }
  0xfc   :  { %v1040_v22 = vrot.slane %v1039_v53, 1  ;;  %v1033_v23 = vrot.slane %v1032_v1, 1  ;;  %v1049_v56 = vadd.f32 %v985_v8, %v969_v49  ;;  %v986_v24 = vmul.f32 %v1653_v15, %v727_v51  ;;  %v952_v7 = vpop.f32.mrb[13].mxu1 }
  0xfd   :  { %v1027_v57 = vadd.f32 %v1026_v54, %v1025_v0  ;;  %v1047_v25 = vrot.slane %v1046_v20, 1  ;;  %v1063_v26 = vadd.f32 %v987_v55, %v971_v62  ;;  %v988_v12 = vmul.f32 %v1658_v17, %v804_v5 }
  0xfe   :  { %v1041_v13 = vadd.f32 %v1040_v22, %v1039_v53  ;;  %v1034_v27 = vadd.f32 %v1033_v23, %v1032_v1  ;;  %v1050_v28 = vrot.slane %v1049_v56, 4  ;;  %v1056_v29 = vadd.f32 %v986_v24, %v970_v4  ;;  %v879_v60 = vpop.f32.mrb[14].mxu0 }
  0xff   :  { %v1048_v30 = vadd.f32 %v1047_v25, %v1046_v20  ;;  %v1064_v14 = vrot.slane %v1063_v26, 4  ;;  %v1070_v61 = vadd.f32 %v988_v12, %v972_v6  ;;  %v973_v31 = vmul.f32 %v1661_v18, %v873_v10  ;;  %v956_v32 = vpop.f32.mrb[14].mxu1  ;;  %v881_v33 = vpop.f32.mrb[15].mxu0 }
 0x100   :  { %v1107_v35 = vadd.f32 %v1034_v27, %v1027_v57  ;;  %v1051_v15 = vadd.f32 %v1050_v28, %v1049_v56  ;;  %v1057_v36 = vrot.slane %v1056_v29, 4  ;;  %v975_v9 = vmul.f32 %v1664_v19, %v950_v21  ;;  %v958_v37 = vpop.f32.mrb[15].mxu1 }
 0x101   :  { %v1108_v38 = vadd.f32 %v1048_v30, %v1041_v13  ;;  %v1065_v17 = vadd.f32 %v1064_v14, %v1063_v26  ;;  %v1071_v41 = vrot.slane %v1070_v61, 4  ;;  %v974_v42 = vmul.f32 %v1679_v34, %v875_v11 }
 0x102   :  { %v1052_v43 = vrot.slane %v1051_v15, 2  ;;  %v1058_v45 = vadd.f32 %v1057_v36, %v1056_v29  ;;  %v976_v46 = vmul.f32 %v1685_v39, %v952_v7  ;;  %v989_v47 = vmul.f32 %v1690_v40, %v879_v60 }
 0x103   :  { %v1114_v18 = vadd.f32 %v1108_v38, %v1107_v35  ;;  %v1066_v49 = vrot.slane %v1065_v17, 2  ;;  %v1072_v50 = vadd.f32 %v1071_v41, %v1070_v61  ;;  %v991_v51 = vmul.f32 %v1696_v44, %v956_v32 }
 0x104   :  { %v1053_v52 = vadd.f32 %v1052_v43, %v1051_v15  ;;  %v1059_v58 = vrot.slane %v1058_v45, 2  ;;  %v1077_v19 = vadd.f32 %v989_v47, %v973_v31  ;;  %v990_v59 = vmul.f32 %v1701_v2, %v881_v33 }
 0x105   :  { %v1117_v62 = vadd.f32 %v1114_v18, %v1113_v16  ;;  %v1067_v5 = vadd.f32 %v1066_v49, %v1065_v17  ;;  %v1073_v63 = vrot.slane %v1072_v50, 2  ;;  %v1091_v34 = vadd.f32 %v991_v51, %v975_v9 }
 0x106   :  { %v1054_v0 = vrot.slane %v1053_v52, 1  ;;  %v1060_v3 = vadd.f32 %v1059_v58, %v1058_v45  ;;  %v1078_v4 = vrot.slane %v1077_v19, 4  ;;  %v1084_v39 = vadd.f32 %v990_v59, %v974_v42 }
 0x107   :  { %v1068_v53 = vrot.slane %v1067_v5, 1  ;;  %v1074_v40 = vadd.f32 %v1073_v63, %v1072_v50  ;;  %v1092_v1 = vrot.slane %v1091_v34, 4  ;;  %v992_v6 = vmul.f32 %v1705_v48, %v958_v37 }
 0x108   :  { %v1055_v8 = vadd.f32 %v1054_v0, %v1053_v52  ;;  %v1061_v44 = vrot.slane %v1060_v3, 1  ;;  %v1079_v10 = vadd.f32 %v1078_v4, %v1077_v19  ;;  %v1085_v54 = vrot.slane %v1084_v39, 4 }
 0x109   :  { %v1069_v20 = vadd.f32 %v1068_v53, %v1067_v5  ;;  %v1075_v55 = vrot.slane %v1074_v40, 1  ;;  %v1093_v2 = vadd.f32 %v1092_v1, %v1091_v34  ;;  %v1098_v16 = vadd.f32 %v992_v6, %v976_v46 }
 0x10a   :  { %v1062_v21 = vadd.f32 %v1061_v44, %v1060_v3  ;;  %v1080_v11 = vrot.slane %v1079_v10, 2  ;;  %v1086_v22 = vadd.f32 %v1085_v54, %v1084_v39 }
 0x10b   :  { %v1076_v23 = vadd.f32 %v1075_v55, %v1074_v40  ;;  %v1094_v56 = vrot.slane %v1093_v2, 2  ;;  %v1099_v24 = vrot.slane %v1098_v16, 4 }
 0x10c   :  { %v1109_v7 = vadd.f32 %v1062_v21, %v1055_v8  ;;  %v1081_v57 = vadd.f32 %v1080_v11, %v1079_v10  ;;  %v1087_v25 = vrot.slane %v1086_v22, 2 }
 0x10d   :  { %v1110_v26 = vadd.f32 %v1076_v23, %v1069_v20  ;;  %v1095_v12 = vadd.f32 %v1094_v56, %v1093_v2  ;;  %v1100_v48 = vadd.f32 %v1099_v24, %v1098_v16 }
 0x10e   :  { %v1082_v13 = vrot.slane %v1081_v57, 1  ;;  %v1088_v27 = vadd.f32 %v1087_v25, %v1086_v22 }
 0x10f   :  { %v1115_v28 = vadd.f32 %v1110_v26, %v1109_v7  ;;  %v1096_v29 = vrot.slane %v1095_v12, 1  ;;  %v1101_v60 = vrot.slane %v1100_v48, 2 }
 0x110   :  { %v1083_v30 = vadd.f32 %v1082_v13, %v1081_v57  ;;  %v1089_v14 = vrot.slane %v1088_v27, 1 }
 0x111   :  { %v1102_v61 = vadd.f32 %v1101_v60, %v1100_v48  ;;  %v1097_v32 = vadd.f32 %v1096_v29, %v1095_v12 }
 0x112   :  { %v1090_v31 = vadd.f32 %v1089_v14, %v1088_v27 }
 0x113   :  { %v1103_v33 = vrot.slane %v1102_v61, 1 }
 0x114   :  { %v1111_v35 = vadd.f32 %v1090_v31, %v1083_v30 }
 0x115   :  { %v1104_v15 = vadd.f32 %v1103_v33, %v1102_v61 }
 0x117   :  { %v1112_v36 = vadd.f32 %v1104_v15, %v1097_v32 }
 0x119   :  { %v1116_v9 = vadd.f32 %v1112_v36, %v1111_v35 }
 0x11b   :  { %v1118_v37 = vadd.f32 %v1116_v9, %v1115_v28 }
 0x11d   :  { %v1119_v38 = vadd.f32 %v1118_v37, %v1117_v62 }
 0x11f   :  { %1273 = vrcp.f32 %v1119_v38 }
 0x129   :  { %v1274_v17 = vpop.eup %1273 }
 0x12a   :  { %1122 = vst [vmem:[%s1735_s2] sm:$0x1] %v1274_v17 }

</bundles_post_ra>
